<compile_context>
chip_gen: v7x
topology: tpu7x:2x2x1
jax: 0.10.0
libtpu: 0.0.40
codegen_flags: <defaults>
</compile_context>

<pallas_src>
import functools
import math

import jax
import jax.numpy as jnp
from jax.experimental import pallas as pl
from jax.experimental.pallas import tpu as pltpu


_LANES = 128
_SUBLANES = 8
_CORES = 2                               # leading "parallel" slab axis (v7x megacore)
_TARGET_TILE_BYTES = 4 * 1024 * 1024     # ~4 MiB per input tile per grid step
_VMEM_LIMIT_BYTES = 40 * 1024 * 1024     # 2 inputs x 2 buffers x 4 MiB = 16 MiB (+headroom);
                                         # > v5e's 16 MiB default, < v7x's 64 MiB physical.


def _gradloss_kernel(f_ref, r_ref, o_ref, *, tm, valid_rows, needs_mask):
    j = pl.program_id(1)

    @pl.when(j == 0)
    def _():
        o_ref[...] = jnp.zeros_like(o_ref)

    # f_ref / r_ref are (tm, 128) tiles (leading core-slab dim is squeezed).
    diff = jnp.abs(
        r_ref[...].astype(jnp.float32) - f_ref[...].astype(jnp.float32)
    )

    def accumulate(d):
        # (tm, 128) -> (tm//8, 8, 128), reduce the leading axis: pure in-lane
        # VPU adds into the resident (8, 128) accumulator.  The single
        # cross-lane reduce happens once, in the wrapper.
        k = tm // _SUBLANES
        rem = tm - k * _SUBLANES
        if rem == 0:
            o_ref[...] += jnp.sum(d.reshape(k, _SUBLANES, _LANES), axis=0)
        else:
            # Tiny-input path only (tm == full slab height, single block).
            if k > 0:
                o_ref[...] += jnp.sum(
                    d[: k * _SUBLANES].reshape(k, _SUBLANES, _LANES), axis=0
                )
            o_ref[0:rem, :] += d[k * _SUBLANES:, :]

    if not needs_mask:
        # rows_half % tm == 0 (static): no masking anywhere.
        accumulate(diff)
    else:
        last = pl.num_programs(1) - 1

        @pl.when(j != last)
        def _():
            accumulate(diff)

        @pl.when(j == last)
        def _():
            # Row predicate only: (tm, 1) iota, broadcast across lanes by the
            # where.  Out-of-bounds tile contents are unspecified -> zeroed.
            row_ids = jax.lax.broadcasted_iota(jnp.int32, (tm, 1), 0) + j * tm
            accumulate(jnp.where(row_ids < valid_rows, diff, 0.0))


def grad_loss(grad_fake, grad_real, *, tile_rows=None):
    """Pallas implementation of GradLoss.forward. Returns a float32 scalar.

    tile_rows: optional override of the row-tile size (testing only; must be
    a multiple of 8).
    """
    assert grad_fake.shape == grad_real.shape, "shapes must match"
    total = math.prod(grad_fake.shape)

    f = grad_fake.reshape(-1)
    r = grad_real.reshape(-1)

    rows = total // _LANES                  # full 128-lane rows
    lane_tail = total - rows * _LANES       # < 128 elements

    # Sub-128 remainder (rare): plain JAX, added to the kernel partials.
    if lane_tail:
        tail_sum = jnp.sum(
            jnp.abs(
                r[rows * _LANES:].astype(jnp.float32)
                - f[rows * _LANES:].astype(jnp.float32)
            )
        )
    else:
        tail_sum = jnp.float32(0.0)

    if rows == 0:
        # Degenerate tiny input (< 128 elements): tail path covers it all.
        return tail_sum / jnp.float32(total)

    # Core-slab split: 2 slabs when the row count allows it (v7x megacore),
    # otherwise a single slab.  Any remaining raggedness (rows_half not a
    # multiple of the tile) is handled by the in-kernel mask, not by slicing.
    cores = _CORES if rows % _CORES == 0 else 1
    rows_half = rows // cores

    # Dtype-aware row-tile size targeting ~4 MiB per input tile per step.
    itemsize = jnp.dtype(grad_fake.dtype).itemsize
    tm_full = max(
        _SUBLANES,
        (_TARGET_TILE_BYTES // (_LANES * itemsize)) // _SUBLANES * _SUBLANES,
    )
    if tile_rows is not None:
        assert tile_rows % _SUBLANES == 0, "tile_rows must be a multiple of 8"
        tm_full = tile_rows
    tm = min(tm_full, rows_half)            # == rows_half (full extent) if smaller
    n_j = pl.cdiv(rows_half, tm)
    needs_mask = (rows_half % tm) != 0

    if lane_tail:
        # Only when total is not a multiple of 128: a prefix slice is needed
        # for a lane-dense 2-D view.  allow_input_fusion lets XLA fuse the
        # slice+reshape into the kernel's input DMA instead of materializing
        # a near-full HBM copy of both inputs.
        fb = jax.lax.slice(f, (0,), (rows * _LANES,))
        rb = jax.lax.slice(r, (0,), (rows * _LANES,))
        fusion = [True, True]
    else:
        fb, rb = f, r
        fusion = None

    f3 = fb.reshape(cores, rows_half, _LANES)   # free (contiguous) reshape
    r3 = rb.reshape(cores, rows_half, _LANES)

    kernel = functools.partial(
        _gradloss_kernel, tm=tm, valid_rows=rows_half, needs_mask=needs_mask
    )

    partials = pl.pallas_call(
        kernel,
        out_shape=jax.ShapeDtypeStruct((cores, _SUBLANES, _LANES), jnp.float32),
        grid=(cores, n_j),
        in_specs=[
            pl.BlockSpec((None, tm, _LANES), lambda c, j: (c, j, 0)),
            pl.BlockSpec((None, tm, _LANES), lambda c, j: (c, j, 0)),
        ],
        out_specs=pl.BlockSpec((None, _SUBLANES, _LANES), lambda c, j: (c, 0, 0)),
        compiler_params=pltpu.CompilerParams(
            dimension_semantics=("parallel", "arbitrary"),
            vmem_limit_bytes=_VMEM_LIMIT_BYTES,
            allow_input_fusion=fusion,
        ),
    )(f3, r3)

    return (jnp.sum(partials) + tail_sum) / jnp.float32(total)


if __name__ == "__main__":
    key = jax.random.PRNGKey(0)
    k_fake, k_real = jax.random.split(key)

    # Small NCHW-shaped gradient maps, consistent with the loss's usage.
    shape = (2, 4, 16, 16)
    grad_fake = jax.random.normal(k_fake, shape, dtype=jnp.float32)
    grad_real = jax.random.normal(k_real, shape, dtype=jnp.float32)

    loss = jax.block_until_ready(grad_loss(grad_fake, grad_real))
    ref = jnp.mean(jnp.abs(grad_real - grad_fake))
    assert jnp.allclose(loss, ref, rtol=1e-5, atol=1e-6), (loss, ref)

    # Coverage: partial last row-block (gated mask) + 2-slab split,
    # forced small tile so the masked path is actually traced and run.
    shape2 = (2, 9, 128)   # 2304 elems -> rows=18, cores=2, rows_half=9
    a2 = jax.random.normal(k_fake, shape2, dtype=jnp.float32)
    b2 = jax.random.normal(k_real, shape2, dtype=jnp.float32)
    loss2 = jax.block_until_ready(grad_loss(a2, b2, tile_rows=8))
    ref2 = jnp.mean(jnp.abs(b2 - a2))
    assert jnp.allclose(loss2, ref2, rtol=1e-5, atol=1e-6), (loss2, ref2)

    # Coverage: ragged total (not a multiple of 128) -> fused prefix slice,
    # JAX lane-tail, single slab (odd row count), sub-8-row fold path.
    shape3 = (5, 7, 11)    # 385 elems -> rows=3 (odd), lane_tail=1
    a3 = jax.random.normal(k_fake, shape3, dtype=jnp.float32)
    b3 = jax.random.normal(k_real, shape3, dtype=jnp.float32)
    loss3 = jax.block_until_ready(grad_loss(a3, b3))
    ref3 = jnp.mean(jnp.abs(b3 - a3))
    assert jnp.allclose(loss3, ref3, rtol=1e-5, atol=1e-6), (loss3, ref3)

    print("KERNEL_OK")
</pallas_src>

<mosaic_0001>
module attributes {stable_mosaic.version = 11 : i64} {
  func.func @_gradloss_kernel(%arg0: i32, %arg1: i32, %arg2: memref<1x8x128xf32, #tpu.memory_space<vmem>>, %arg3: memref<1x8x128xf32, #tpu.memory_space<vmem>>, %arg4: memref<1x8x128xf32, #tpu.memory_space<vmem>>) attributes {dimension_semantics = [#tpu.dimension_semantics<parallel>, #tpu.dimension_semantics<arbitrary>], iteration_bounds = array<i64: 2, 1>, scalar_prefetch = 0 : i64, scratch_operands = 0 : i64, tpu.core_type = #tpu.core_type<tc>, window_params = [{transform_indices = @transform_0, window_bounds = array<i64: 1, 8, 128>}, {transform_indices = @transform_1, window_bounds = array<i64: 1, 8, 128>}, {transform_indices = @transform_2, window_bounds = array<i64: 1, 8, 128>}]} {
    %c0_i32 = arith.constant 0 : i32
    %0 = arith.cmpi eq, %arg1, %c0_i32 : i32
    %1 = arith.extui %0 : i1 to i32
    %c0_i32_0 = arith.constant 0 : i32
    %2 = arith.cmpi ne, %1, %c0_i32_0 : i32
    scf.if %2 {
      %cst_12 = arith.constant 0.000000e+00 : f32
      %17 = vector.broadcast %cst_12 : f32 to vector<8x128xf32>
      %c0_13 = arith.constant 0 : index
      %c0_14 = arith.constant 0 : index
      %c0_15 = arith.constant 0 : index
      %18 = vector.load %arg4[%c0_13, %c0_14, %c0_15] : memref<1x8x128xf32, #tpu.memory_space<vmem>>, vector<1x8x128xf32>
      %19 = vector.shape_cast %18 : vector<1x8x128xf32> to vector<8x128xf32>
      %20 = vector.shape_cast %17 : vector<8x128xf32> to vector<1x8x128xf32>
      tpu.vector_store %arg4[%c0_13, %c0_14, %c0_15], %20 {strides = array<i32>} : memref<1x8x128xf32, #tpu.memory_space<vmem>>, vector<1x8x128xf32>,
    } else {
    }
    %c0 = arith.constant 0 : index
    %c0_1 = arith.constant 0 : index
    %c0_2 = arith.constant 0 : index
    %3 = vector.load %arg3[%c0, %c0_1, %c0_2] : memref<1x8x128xf32, #tpu.memory_space<vmem>>, vector<1x8x128xf32>
    %4 = vector.shape_cast %3 : vector<1x8x128xf32> to vector<8x128xf32>
    %c0_3 = arith.constant 0 : index
    %c0_4 = arith.constant 0 : index
    %c0_5 = arith.constant 0 : index
    %5 = vector.load %arg2[%c0_3, %c0_4, %c0_5] : memref<1x8x128xf32, #tpu.memory_space<vmem>>, vector<1x8x128xf32>
    %6 = vector.shape_cast %5 : vector<1x8x128xf32> to vector<8x128xf32>
    %7 = arith.subf %4, %6 : vector<8x128xf32>
    %8 = math.absf %7 : vector<8x128xf32>
    %c0_6 = arith.constant 0 : index
    %c0_7 = arith.constant 0 : index
    %c0_8 = arith.constant 0 : index
    %9 = vector.load %arg4[%c0_6, %c0_7, %c0_8] : memref<1x8x128xf32, #tpu.memory_space<vmem>>, vector<1x8x128xf32>
    %10 = vector.shape_cast %9 : vector<1x8x128xf32> to vector<8x128xf32>
    %11 = vector.shape_cast %8 : vector<8x128xf32> to vector<1x8x128xf32>
    %cst = arith.constant dense<0.000000e+00> : vector<8x128xf32>
    %12 = vector.multi_reduction <add>, %11, %cst [0] : vector<1x8x128xf32> to vector<8x128xf32>
    %13 = arith.addf %10, %12 : vector<8x128xf32>
    %c0_9 = arith.constant 0 : index
    %c0_10 = arith.constant 0 : index
    %c0_11 = arith.constant 0 : index
    %14 = vector.load %arg4[%c0_9, %c0_10, %c0_11] : memref<1x8x128xf32, #tpu.memory_space<vmem>>, vector<1x8x128xf32>
    %15 = vector.shape_cast %14 : vector<1x8x128xf32> to vector<8x128xf32>
    %16 = vector.shape_cast %13 : vector<8x128xf32> to vector<1x8x128xf32>
    tpu.vector_store %arg4[%c0_9, %c0_10, %c0_11], %16 {strides = array<i32>} : memref<1x8x128xf32, #tpu.memory_space<vmem>>, vector<1x8x128xf32>,
    return
  }
  func.func @transform_0(%arg0: i32, %arg1: i32) -> (i32, i32, i32) {
    %c0_i32 = arith.constant 0 : i32
    %c0_i32_0 = arith.constant 0 : i32
    return %arg0, %arg1, %c0_i32 : i32, i32, i32
  }
  func.func @transform_1(%arg0: i32, %arg1: i32) -> (i32, i32, i32) {
    %c0_i32 = arith.constant 0 : i32
    %c0_i32_0 = arith.constant 0 : i32
    return %arg0, %arg1, %c0_i32 : i32, i32, i32
  }
  func.func @transform_2(%arg0: i32, %arg1: i32) -> (i32, i32, i32) {
    %c0_i32 = arith.constant 0 : i32
    %c0_i32_0 = arith.constant 0 : i32
    %c0_i32_1 = arith.constant 0 : i32
    return %arg0, %c0_i32, %c0_i32_0 : i32, i32, i32
  }
}

</mosaic_0001>

<bundles_post_ra>
// kernel: tpu_custom_call.1
= control target key start
LH: loop header
LB: loop body
LE: loop exit
PB: predicated region body
PF: predicated region fallthrough
CT: control target
= control target key end

     0   :  { %7 = vsyncpa [#allocation3], 0  ;;  %s814_s0 = inlined_call_operand.hbm [shape: f32[2,8,128], index: 0, kind: input, shape index: {}]   ;;  %s815_s1 = inlined_call_operand.hbm [shape: f32[2,8,128], index: 1, kind: input, shape index: {}]   ;;  %s816_s2 = inlined_call_operand.hbm [shape: f32[2,8,128], index: 2, kind: output, shape index: {}]  }
   0x1   :  { %9 = vsyncpa [#allocation3 + $0x1], 0 }
   0x2   :  { %10 = vsyncpa [#allocation6], 0 }
   0x3   :  { %12 = vsyncpa [#allocation6 + $0x1], 0 }
   0x4   :  { %13 = vsyncpa [#allocation4], 0 }
   0x5   :  { %15 = vsyncpa [#allocation4 + $0x1], 0  ;;  %s594_s9 = smov 0   ;;  %s596_s10 = smov 0  }
   0x6   :  { %s598_s11 = smov 0   ;;  %s600_s12 = smov 0  }
   0x7   :  { %s602_s13 = smov 0   ;;  %s604_s14 = smov 0  }
   0x8 LB: > { %s344_s15 = sadd.s32 4294967295, %s574_s14   ;;  %s345_s16 = sadd.s32 4294967294, %s574_s14   ;;  %s574_s14 = sphi %s604_s14, %s21_s14   ;;  %s570_s13 = sphi %s602_s13, %s836_s13   ;;  %s566_s12 = sphi %s600_s12, %s835_s12   ;;  %s562_s11 = sphi %s598_s11, %s834_s11   ;;  %s558_s10 = sphi %s596_s10, %s833_s10   ;;  %s554_s9 = sphi %s594_s9, %s832_s9  }
   0x9   : > { %s33_s17 = sadd.s32 1, %s570_s13  ;;  %s42_s18 = sadd.s32 1, %s562_s11 }
   0xa   : > { %p35_p0 = scmp.ge.s32.totalorder %s33_s17, 2  ;;  %p49_p1 = scmp.ne.s32.totalorder %s562_s11, %s558_s10 }
   0xb   : > { %p50_p2 = scmp.eq.s32.totalorder %s574_s14, 0  ;;  %p55_p3 = scmp.ne.s32.totalorder %s558_s10, %s554_s9 }
   0xc   : > { %s838_s17 = smov (%p35_p0, %s33_s17), 0  ;;  %p56_p5 = scmp.eq.s32.totalorder %s344_s15, 0 }
   0xd   : > { %p635_p4 = por %p50_p2, %p49_p1  ;;  %s37_s20 = ssub.s32 %s570_s13, %s838_s17 }
   0xe   : > { %p107_p6 = scmp.eq.s32.totalorder %s344_s15, 1  ;;  %p40_p7 = scmp.eq.s32.totalorder %s37_s20, 0 }
   0xf   : > { %p641_p8 = por %p56_p5, %p55_p3  ;;  %p113_p10 = scmp.eq.s32.totalorder %s345_s16, 1 }
  0x10   : > { %p645_p9 = por %p107_p6, %p49_p1  ;;  %p377_p13 = scmp.lt.s32.totalorder %s574_s14, 2 }
  0x11   : > { %s820_s21 = scalar_select %p641_p8, 1, 0 }
  0x12   : > { %s821_s22 = scalar_select %p645_p9, 1, 0 }
  0x13   : > { %s650_s23 = scalar_select %p40_p7, %s562_s11, %s42_s18  }
  0x14   : > { %p652_p11 = por %p113_p10, %p55_p3  ;;  %s659_s25 = sand.u32 1, %s562_s11  }
  0x15   : > { %s348_s26 = sshll.u32 %s659_s25, 3  ;;  %s349_s27 = sshll.u32 %s570_s13, 7 }
  0x16   : > { %s822_s24 = scalar_select %p652_p11, 1, 0 }
  0x17   : > { %s668_s30 = scalar_lea.hbm %s814_s0, %s349_s27  ;;  %s137_s3 = scalar_lea.vmem [#allocation2], %s348_s26 }
  0x18   : > { %s145_s4 = sshll.u32 %s137_s3, 4  ;;  %p676_p0 = pnand %p377_p13, %p635_p4  ;;  %s672_s4 = int_to_ptr.vmem [resolvable:$true] %s145_s4 }
  0x19   : > { %s134_s6 = scalar_lea.sflag [#allocation3], %s659_s25  ;;  %s428_s7 = scalar_lea.hbm %s668_s30, 128 }
  0x1a   : > { %p429_p3 = scmp.ne.s32.totalorder %s668_s30, %s428_s7  ;;  %p430_p5 = pneg %p676_p0 }
  0x1b   : > { %s433_s16 = scalar_lea.hbm %s814_s0, 256  ;;  %p434_p4 = scmp.lt.u32.totalorder %s668_s30, %s814_s0 }
  0x1c   : > { %p431_p6 = pnand %p430_p5, %p429_p3  ;;  %p435_p10 = scmp.lt.u32.totalorder %s433_s16, %s428_s7 }
  0x1d   : > { %p437_p12 = scmp.lt.u32.totalorder %s428_s7, %s668_s30 }
  0x1e   : > { %p432_p7 = pneg %p431_p6  ;;  %p436_p13 = por %p435_p10, %p434_p4 }
  0x20   : > { %p438_p1 = por %p437_p12, %p436_p13 }
  0x22   : > { %p439_p2 = pnand %p438_p1, %p432_p7 }
  0x24   : > { %442 = shalt.err (!%p439_p2)
}
  0x25   : > { %s443_s20 = scalar_lea.vmem %s672_s4, 128  ;;  %s576_s28 = smov [#allocation2]  }
  0x26   : > { %p444_p3 = scmp.ne.s32.totalorder %s672_s4, %s443_s20  ;;  %s448_s29 = sshll.u32 %s576_s28, 4  ;;  %s449_s29 = int_to_ptr.vmem [resolvable:$false] %s448_s29 }
  0x27   : > { %s450_s3 = scalar_lea.vmem %s449_s29, 256  ;;  %p451_p9 = scmp.lt.s32.totalorder %s672_s4, %s449_s29 }
  0x28   : > { %p446_p6 = pnand %p444_p3, %p430_p5  ;;  %p452_p4 = scmp.lt.s32.totalorder %s450_s3, %s443_s20 }
  0x2a   : > { %p447_p11 = pneg %p446_p6  ;;  %p453_p10 = por %p452_p4, %p451_p9 }
  0x2c   : > { %p454_p12 = pnand %p453_p10, %p447_p11 }
  0x2e   : > { %457 = shalt.err (!%p454_p12)
}
  0x2f   : > { %369 = dma.hbm_to_vmem [thread:$0]  (!%p676_p0), %s668_s30, 128, %s672_s4, %s134_s6  }
  0x30   : > { %p824_p1 = scmp.lt.s32.totalorder %s574_s14, 3  ;;  %p825_p2 = scmp.ge.s32.totalorder %s574_s14, 1 }
  0x31   : > { %s721_s16 = scalar_lea.hbm %s815_s1, %s349_s27  ;;  %s156_s18 = scalar_lea.vmem [#allocation5], %s348_s26 }
  0x32   : > { %p712_p7 = pnand %p825_p2, %p824_p1  ;;  %s164_s19 = sshll.u32 %s156_s18, 4  ;;  %s165_s19 = int_to_ptr.vmem [resolvable:$true] %s164_s19 }
  0x33   : > { %s153_s30 = scalar_lea.sflag [#allocation6], %s659_s25  ;;  %s458_s4 = scalar_lea.hbm %s721_s16, 128 }
  0x34   : > { %s826_s7 = scalar_select %p712_p7, 1, 0 }
  0x35   : > { %p459_p9 = scmp.ne.s32.totalorder %s721_s16, %s458_s4  ;;  %s463_s27 = scalar_lea.hbm %s815_s1, 256 }
  0x36   : > { %p464_p3 = scmp.lt.u32.totalorder %s721_s16, %s815_s1  ;;  %p465_p6 = scmp.lt.u32.totalorder %s463_s27, %s458_s4 }
  0x37   : > { %p461_p11 = pnand %p459_p9, %p430_p5  ;;  %p467_p10 = scmp.lt.u32.totalorder %s458_s4, %s721_s16 }
  0x38   : > { %p466_p4 = por %p465_p6, %p464_p3 }
  0x39   : > { %p462_p13 = pneg %p461_p11 }
  0x3a   : > { %p468_p12 = por %p467_p10, %p466_p4 }
  0x3c   : > { %p469_p1 = pnand %p468_p12, %p462_p13 }
  0x3e   : > { %472 = shalt.err (!%p469_p1)
}
  0x3f   : > { %s473_s25 = scalar_lea.vmem %s165_s19, 128  ;;  %s577_s26 = smov [#allocation5]  }
  0x40   : > { %p474_p2 = scmp.ne.s32.totalorder %s165_s19, %s473_s25  ;;  %s478_s3 = sshll.u32 %s577_s26, 4  ;;  %s479_s3 = int_to_ptr.vmem [resolvable:$false] %s478_s3 }
  0x41   : > { %s480_s8 = scalar_lea.vmem %s479_s3, 256  ;;  %p481_p8 = scmp.lt.s32.totalorder %s165_s19, %s479_s3 }
  0x42   : > { %p476_p9 = pnand %p474_p2, %p430_p5  ;;  %p482_p7 = scmp.lt.s32.totalorder %s480_s8, %s473_s25 }
  0x44   : > { %p477_p11 = pneg %p476_p9  ;;  %p483_p3 = por %p482_p7, %p481_p8 }
  0x46   : > { %p484_p6 = pnand %p483_p3, %p477_p11 }
  0x48   : > { %487 = shalt.err (!%p484_p6)
}
  0x49   : > { %372 = dma.hbm_to_vmem [thread:$0]  (!%p676_p0), %s721_s16, 128, %s165_s19, %s153_s30  }
  0x4a   : > { %p827_p13 = scmp.ne.s32.totalorder %s826_s7, 0 }
  0x4b   : > { %s748_s15 = sand.u32 (!%p827_p13), 1, %s558_s10   ;;  %p828_p5 = scmp.ne.s32.totalorder (!%p827_p13), %s820_s21, 0 }
  0x4c   : > { %173 = sbr.rel (%p827_p13) target bundleno = 112 (0x70), region = 28  ;;  %s353_s18 = sshll.u32 (!%p827_p13), %s748_s15, 3 }
  0x4d   : > { %s176_s4 = scalar_lea.sflag (!%p827_p13), [#allocation3], %s748_s15  ;;  %s179_s6 = scalar_lea.vmem (!%p827_p13), [#allocation2], %s353_s18 }
  0x53   : > { %541 = dma.done.wait (%p828_p5), %s176_s4, 128  }
  0x54   : > { %543 = vsyncadd (%p828_p5), %s176_s4, 4294967168  ;;  %s185_s5 = scalar_lea.sflag [#allocation6], %s748_s15  ;;  %s188_s16 = scalar_lea.vmem [#allocation5], %s353_s18 }
  0x55   : > { %545 = dma.done.wait (%p828_p5), %s185_s5, 128  }
  0x56   : > { %547 = vsyncadd (%p828_p5), %s185_s5, 4294967168  ;;  %v219_v0 = vld [vmem:[%s188_s16] sm:$0xff]  ;;  %v220_v1 = vld [vmem:[%s179_s6] sm:$0xff]  ;;  %s357_s7 = sshll.u32 %s566_s12, 7  ;;  %s213_s19 = scalar_lea.vmem [#allocation7], %s353_s18 }
  0x57   : > { %v221_v2 = vsub.f32 %v219_v0, %v220_v1  ;;  %s241_s30 = sshll.u32 %s213_s19, 4  ;;  %s765_s28 = scalar_lea.hbm %s816_s2, %s357_s7  ;;  %s767_s30 = int_to_ptr.vmem [resolvable:$true] %s241_s30 }
  0x58   : > { %s228_s21 = scalar_lea.sflag [#allocation4], %s748_s15  ;;  %s488_s29 = scalar_lea.vmem %s767_s30, 128 }
  0x59   : > { %v222_v3 = vand.u32 2147483647, %v221_v2  ;;  %p489_p8 = scmp.ne.s32.totalorder %s767_s30, %s488_s29  ;;  %p829_p0 = scmp.ne.s32.totalorder %s821_s22, 0 }
  0x5a   : > { %s578_s12 = smov [#allocation7]  }
  0x5b   : > { %226 = vst [vmem:[%s213_s19] sm:$0xff] %v222_v3  ;;  %p490_p7 = pnand %p489_p8, %p829_p0  ;;  %s492_s25 = sshll.u32 %s578_s12, 4  ;;  %s493_s25 = int_to_ptr.vmem [resolvable:$false] %s492_s25 }
  0x5c   : > { %s494_s26 = scalar_lea.vmem %s493_s25, 256  ;;  %p495_p10 = scmp.lt.s32.totalorder %s767_s30, %s493_s25 }
  0x5d   : > { %p491_p4 = pneg %p490_p7  ;;  %p496_p12 = scmp.lt.s32.totalorder %s494_s26, %s488_s29 }
  0x5f   : > { %p497_p1 = por %p496_p12, %p495_p10 }
  0x61   : > { %p498_p2 = pnand %p497_p1, %p491_p4 }
  0x63   : > { %501 = shalt.err (!%p498_p2)
}
  0x64   : > { %s502_s3 = scalar_lea.hbm %s765_s28, 128  ;;  %s506_s18 = scalar_lea.hbm %s816_s2, 256 }
  0x65   : > { %p503_p9 = scmp.ne.s32.totalorder %s765_s28, %s502_s3  ;;  %p507_p6 = scmp.lt.u32.totalorder %s765_s28, %s816_s2 }
  0x66   : > { %p508_p13 = scmp.lt.u32.totalorder %s506_s18, %s502_s3  ;;  %p510_p8 = scmp.lt.u32.totalorder %s502_s3, %s765_s28 }
  0x67   : > { %p504_p11 = pnand %p503_p9, %p829_p0 }
  0x68   : > { %p509_p5 = por %p508_p13, %p507_p6 }
  0x69   : > { %p505_p3 = pneg %p504_p11 }
  0x6a   : > { %p511_p7 = por %p510_p8, %p509_p5 }
  0x6c   : > { %p512_p4 = pnand %p511_p7, %p505_p3 }
  0x6e   : > { %515 = shalt.err (!%p512_p4)
}
  0x6f   : > { %364 = dma.vmem_to_hbm [thread:$0]  (%p829_p0), %s767_s30, 128, %s765_s28, %s228_s21  }
  0x70 PF: > { %s253_s5 = sand.u32 1, %s554_s9   ;;  %p830_p10 = scmp.ne.s32.totalorder %s822_s24, 0 }
  0x71   : > { %p831_p12 = scmp.ge.s32.totalorder %s574_s14, 2  ;;  %s254_s16 = scalar_lea.sflag [#allocation4], %s253_s5 }
  0x73   : > { %p374_p1 = pnand %p831_p12, %p830_p10 }
  0x75   : > { %549 = dma.done.wait (!%p374_p1), %s254_s16, 128  }
  0x76   : > { %551 = vsyncadd (!%p374_p1), %s254_s16, 4294967168  ;;  %s21_s14 = sadd.s32 1, %s574_s14   ;;  %s832_s9 = smov %s558_s10 }
  0x77   : > { %p18_p2 = scmp.ge.s32.totalorder %s21_s14, 4   ;;  %s833_s10 = smov %s562_s11 }
  0x78   : > { %s834_s11 = smov %s650_s23  ;;  %s835_s12 = smov %s570_s13 }
  0x79   : > { %s836_s13 = smov %s838_s17  ;;  %20 = sbr.rel (!%p18_p2) target bundleno = 8 (0x8), region = 90 }
  0x80   :  { %259 = vsyncpa [#allocation3], 1 }
  0x81   :  { %261 = vsyncpa [#allocation3 + $0x1], 1 }
  0x82   :  { %262 = vsyncpa [#allocation6], 1 }
  0x83   :  { %264 = vsyncpa [#allocation6 + $0x1], 1 }
  0x84   :  { %265 = vsyncpa [#allocation4], 1 }
  0x85   :  { %267 = vsyncpa [#allocation4 + $0x1], 1 }

</bundles_post_ra>
